<compile_context>
chip_gen: v7x
topology: tpu7x:2x2x1
jax: 0.10.0
libtpu: 0.0.40
codegen_flags: <defaults>
</compile_context>

<pallas_src>
import jax
import jax.numpy as jnp
from jax.experimental import pallas as pl
from jax.experimental.pallas import tpu as pltpu

_BN_EPS = 1e-5


# ----------------------------------------------------------------------------
# Fused kernel: entire generator forward pass in one program
# ----------------------------------------------------------------------------
def _fused_generator_kernel(x_ref,
                            w0, b0, g0, be0,
                            w1, b1, g1, be1,
                            w2, b2, g2, be2,
                            w3, b3, g3, be3,
                            w4, b4,
                            o_ref):
    def block(x, w_ref, b_ref, gamma_ref, beta_ref):
        # Linear (MXU, f32 accumulation)
        y = jnp.dot(x, w_ref[...], preferred_element_type=jnp.float32) + b_ref[...]
        # BatchNorm1d, training mode: per-feature batch mean / biased variance.
        mean = jnp.mean(y, axis=0, keepdims=True)          # (1, out_dim)
        d = y - mean                                        # reused temporary
        var = jnp.mean(d * d, axis=0, keepdims=True)        # (1, out_dim)
        z = d * jax.lax.rsqrt(var + _BN_EPS) * gamma_ref[...] + beta_ref[...]
        # ReLU
        return jnp.maximum(z, 0.0)

    x = x_ref[...]                                          # (N, z_dim)
    x = block(x, w0, b0, g0, be0)
    x = block(x, w1, b1, g1, be1)
    x = block(x, w2, b2, g2, be2)
    x = block(x, w3, b3, g3, be3)
    # Final Linear + Sigmoid
    y = jnp.dot(x, w4[...], preferred_element_type=jnp.float32) + b4[...]
    o_ref[...] = jax.nn.sigmoid(y)


def generator_forward(params, noise):
    """Equivalent of Generator.forward(noise); noise: (n_samples, z_dim)."""
    flat_inputs = [noise]
    for layer in params[:-1]:
        flat_inputs += [layer["w"], layer["b"], layer["gamma"], layer["beta"]]
    flat_inputs += [params[-1]["w"], params[-1]["b"]]

    n = noise.shape[0]
    im_dim = params[-1]["w"].shape[1]

    vmem_spec = pl.BlockSpec(memory_space=pltpu.MemorySpace.VMEM)
    return pl.pallas_call(
        _fused_generator_kernel,
        out_shape=jax.ShapeDtypeStruct((n, im_dim), jnp.float32),
        in_specs=[vmem_spec] * len(flat_inputs),
        out_specs=vmem_spec,
    )(*flat_inputs)


# ----------------------------------------------------------------------------
# Parameter construction (deterministic, PyTorch-style uniform init)
# Linear weights stored transposed as (in_dim, out_dim) so the kernel does
# x @ W + b directly on the MXU.
# ----------------------------------------------------------------------------
def init_generator_params(key, z_dim, im_dim, hidden_dim):
    dims = [z_dim, hidden_dim, hidden_dim * 2, hidden_dim * 4,
            hidden_dim * 8, im_dim]
    params = []
    for li in range(len(dims) - 1):
        in_d, out_d = dims[li], dims[li + 1]
        key, kw, kb = jax.random.split(key, 3)
        bound = 1.0 / jnp.sqrt(in_d)
        w = jax.random.uniform(kw, (in_d, out_d), jnp.float32, -bound, bound)
        b = jax.random.uniform(kb, (1, out_d), jnp.float32, -bound, bound)
        layer = {"w": w, "b": b}
        if li < len(dims) - 2:  # generator blocks carry batch-norm affine params
            layer["gamma"] = jnp.ones((1, out_d), jnp.float32)
            layer["beta"] = jnp.zeros((1, out_d), jnp.float32)
        params.append(layer)
    return params


# ----------------------------------------------------------------------------
# Reference (plain JAX) for sanity checking
# ----------------------------------------------------------------------------
def generator_forward_ref(params, noise):
    x = noise
    for layer in params[:-1]:
        y = x @ layer["w"] + layer["b"]
        mean = jnp.mean(y, axis=0, keepdims=True)
        var = jnp.mean((y - mean) ** 2, axis=0, keepdims=True)
        y = (y - mean) / jnp.sqrt(var + _BN_EPS)
        y = y * layer["gamma"] + layer["beta"]
        x = jnp.maximum(y, 0.0)
    last = params[-1]
    return jax.nn.sigmoid(x @ last["w"] + last["b"])


if __name__ == "__main__":
    # Small shapes consistent with the module (z_dim -> hidden chain -> im_dim)
    batch = 8
    z_dim = 16
    hidden_dim = 32
    im_dim = 64

    key = jax.random.PRNGKey(0)
    key, knoise, kparams = jax.random.split(key, 3)

    params = init_generator_params(kparams, z_dim, im_dim, hidden_dim)
    noise = jax.random.normal(knoise, (batch, z_dim), jnp.float32)

    out = generator_forward(params, noise)
    out = jax.block_until_ready(out)

    ref = generator_forward_ref(params, noise)
    assert out.shape == (batch, im_dim)
    assert jnp.allclose(out, ref, atol=1e-5, rtol=1e-5), "mismatch vs reference"

    print("KERNEL_OK")
</pallas_src>

<mosaic_0001>
module attributes {stable_mosaic.version = 11 : i64} {
  func.func @_fused_generator_kernel(%arg0: memref<8x16xf32, #tpu.memory_space<vmem>>, %arg1: memref<16x32xf32, #tpu.memory_space<vmem>>, %arg2: memref<1x32xf32, #tpu.memory_space<vmem>>, %arg3: memref<1x32xf32, #tpu.memory_space<vmem>>, %arg4: memref<1x32xf32, #tpu.memory_space<vmem>>, %arg5: memref<32x64xf32, #tpu.memory_space<vmem>>, %arg6: memref<1x64xf32, #tpu.memory_space<vmem>>, %arg7: memref<1x64xf32, #tpu.memory_space<vmem>>, %arg8: memref<1x64xf32, #tpu.memory_space<vmem>>, %arg9: memref<64x128xf32, #tpu.memory_space<vmem>>, %arg10: memref<1x128xf32, #tpu.memory_space<vmem>>, %arg11: memref<1x128xf32, #tpu.memory_space<vmem>>, %arg12: memref<1x128xf32, #tpu.memory_space<vmem>>, %arg13: memref<128x256xf32, #tpu.memory_space<vmem>>, %arg14: memref<1x256xf32, #tpu.memory_space<vmem>>, %arg15: memref<1x256xf32, #tpu.memory_space<vmem>>, %arg16: memref<1x256xf32, #tpu.memory_space<vmem>>, %arg17: memref<256x64xf32, #tpu.memory_space<vmem>>, %arg18: memref<1x64xf32, #tpu.memory_space<vmem>>, %arg19: memref<8x64xf32, #tpu.memory_space<vmem>>) attributes {dimension_semantics = [], scalar_prefetch = 0 : i64, scratch_operands = 0 : i64, tpu.core_type = #tpu.core_type<tc>} {
    %c0 = arith.constant 0 : index
    %c0_0 = arith.constant 0 : index
    %0 = vector.load %arg0[%c0, %c0_0] : memref<8x16xf32, #tpu.memory_space<vmem>>, vector<8x16xf32>
    %c0_1 = arith.constant 0 : index
    %c0_2 = arith.constant 0 : index
    %1 = vector.load %arg1[%c0_1, %c0_2] : memref<16x32xf32, #tpu.memory_space<vmem>>, vector<16x32xf32>
    %cst = arith.constant dense<0.000000e+00> : vector<8x32xf32>
    %2 = tpu.matmul %0, %1, %cst {dimension_numbers = #tpu.dot_dimension_numbers<[1], [0], [0], [1], [0, 0, 1, 1], [], []>} : vector<8x16xf32>, vector<16x32xf32>, vector<8x32xf32> -> vector<8x32xf32>
    %c0_3 = arith.constant 0 : index
    %c0_4 = arith.constant 0 : index
    %3 = vector.load %arg2[%c0_3, %c0_4] : memref<1x32xf32, #tpu.memory_space<vmem>>, vector<1x32xf32>
    %4 = vector.broadcast %3 : vector<1x32xf32> to vector<8x32xf32>
    %5 = arith.addf %2, %4 : vector<8x32xf32>
    %cst_5 = arith.constant dense<0.000000e+00> : vector<32xf32>
    %6 = vector.multi_reduction <add>, %5, %cst_5 [0] : vector<8x32xf32> to vector<32xf32>
    %7 = vector.shape_cast %6 : vector<32xf32> to vector<1x32xf32>
    %cst_6 = arith.constant 8.000000e+00 : f32
    %8 = vector.broadcast %cst_6 : f32 to vector<1x32xf32>
    %9 = arith.divf %7, %8 : vector<1x32xf32>
    %10 = vector.broadcast %9 : vector<1x32xf32> to vector<8x32xf32>
    %11 = arith.subf %5, %10 : vector<8x32xf32>
    %12 = arith.mulf %11, %11 : vector<8x32xf32>
    %cst_7 = arith.constant dense<0.000000e+00> : vector<32xf32>
    %13 = vector.multi_reduction <add>, %12, %cst_7 [0] : vector<8x32xf32> to vector<32xf32>
    %14 = vector.shape_cast %13 : vector<32xf32> to vector<1x32xf32>
    %cst_8 = arith.constant 8.000000e+00 : f32
    %15 = vector.broadcast %cst_8 : f32 to vector<1x32xf32>
    %16 = arith.divf %14, %15 : vector<1x32xf32>
    %cst_9 = arith.constant 9.99999974E-6 : f32
    %17 = vector.broadcast %cst_9 : f32 to vector<1x32xf32>
    %18 = arith.addf %16, %17 : vector<1x32xf32>
    %19 = math.rsqrt %18 : vector<1x32xf32>
    %20 = vector.broadcast %19 : vector<1x32xf32> to vector<8x32xf32>
    %21 = arith.mulf %11, %20 : vector<8x32xf32>
    %c0_10 = arith.constant 0 : index
    %c0_11 = arith.constant 0 : index
    %22 = vector.load %arg3[%c0_10, %c0_11] : memref<1x32xf32, #tpu.memory_space<vmem>>, vector<1x32xf32>
    %23 = vector.broadcast %22 : vector<1x32xf32> to vector<8x32xf32>
    %24 = arith.mulf %21, %23 : vector<8x32xf32>
    %c0_12 = arith.constant 0 : index
    %c0_13 = arith.constant 0 : index
    %25 = vector.load %arg4[%c0_12, %c0_13] : memref<1x32xf32, #tpu.memory_space<vmem>>, vector<1x32xf32>
    %26 = vector.broadcast %25 : vector<1x32xf32> to vector<8x32xf32>
    %27 = arith.addf %24, %26 : vector<8x32xf32>
    %cst_14 = arith.constant 0.000000e+00 : f32
    %28 = vector.broadcast %cst_14 : f32 to vector<8x32xf32>
    %29 = arith.maximumf %27, %28 : vector<8x32xf32>
    %c0_15 = arith.constant 0 : index
    %c0_16 = arith.constant 0 : index
    %30 = vector.load %arg5[%c0_15, %c0_16] : memref<32x64xf32, #tpu.memory_space<vmem>>, vector<32x64xf32>
    %cst_17 = arith.constant dense<0.000000e+00> : vector<8x64xf32>
    %31 = tpu.matmul %29, %30, %cst_17 {dimension_numbers = #tpu.dot_dimension_numbers<[1], [0], [0], [1], [0, 0, 1, 1], [], []>} : vector<8x32xf32>, vector<32x64xf32>, vector<8x64xf32> -> vector<8x64xf32>
    %c0_18 = arith.constant 0 : index
    %c0_19 = arith.constant 0 : index
    %32 = vector.load %arg6[%c0_18, %c0_19] : memref<1x64xf32, #tpu.memory_space<vmem>>, vector<1x64xf32>
    %33 = vector.broadcast %32 : vector<1x64xf32> to vector<8x64xf32>
    %34 = arith.addf %31, %33 : vector<8x64xf32>
    %cst_20 = arith.constant dense<0.000000e+00> : vector<64xf32>
    %35 = vector.multi_reduction <add>, %34, %cst_20 [0] : vector<8x64xf32> to vector<64xf32>
    %36 = vector.shape_cast %35 : vector<64xf32> to vector<1x64xf32>
    %cst_21 = arith.constant 8.000000e+00 : f32
    %37 = vector.broadcast %cst_21 : f32 to vector<1x64xf32>
    %38 = arith.divf %36, %37 : vector<1x64xf32>
    %39 = vector.broadcast %38 : vector<1x64xf32> to vector<8x64xf32>
    %40 = arith.subf %34, %39 : vector<8x64xf32>
    %41 = arith.mulf %40, %40 : vector<8x64xf32>
    %cst_22 = arith.constant dense<0.000000e+00> : vector<64xf32>
    %42 = vector.multi_reduction <add>, %41, %cst_22 [0] : vector<8x64xf32> to vector<64xf32>
    %43 = vector.shape_cast %42 : vector<64xf32> to vector<1x64xf32>
    %cst_23 = arith.constant 8.000000e+00 : f32
    %44 = vector.broadcast %cst_23 : f32 to vector<1x64xf32>
    %45 = arith.divf %43, %44 : vector<1x64xf32>
    %cst_24 = arith.constant 9.99999974E-6 : f32
    %46 = vector.broadcast %cst_24 : f32 to vector<1x64xf32>
    %47 = arith.addf %45, %46 : vector<1x64xf32>
    %48 = math.rsqrt %47 : vector<1x64xf32>
    %49 = vector.broadcast %48 : vector<1x64xf32> to vector<8x64xf32>
    %50 = arith.mulf %40, %49 : vector<8x64xf32>
    %c0_25 = arith.constant 0 : index
    %c0_26 = arith.constant 0 : index
    %51 = vector.load %arg7[%c0_25, %c0_26] : memref<1x64xf32, #tpu.memory_space<vmem>>, vector<1x64xf32>
    %52 = vector.broadcast %51 : vector<1x64xf32> to vector<8x64xf32>
    %53 = arith.mulf %50, %52 : vector<8x64xf32>
    %c0_27 = arith.constant 0 : index
    %c0_28 = arith.constant 0 : index
    %54 = vector.load %arg8[%c0_27, %c0_28] : memref<1x64xf32, #tpu.memory_space<vmem>>, vector<1x64xf32>
    %55 = vector.broadcast %54 : vector<1x64xf32> to vector<8x64xf32>
    %56 = arith.addf %53, %55 : vector<8x64xf32>
    %cst_29 = arith.constant 0.000000e+00 : f32
    %57 = vector.broadcast %cst_29 : f32 to vector<8x64xf32>
    %58 = arith.maximumf %56, %57 : vector<8x64xf32>
    %c0_30 = arith.constant 0 : index
    %c0_31 = arith.constant 0 : index
    %59 = vector.load %arg9[%c0_30, %c0_31] : memref<64x128xf32, #tpu.memory_space<vmem>>, vector<64x128xf32>
    %cst_32 = arith.constant dense<0.000000e+00> : vector<8x128xf32>
    %60 = tpu.matmul %58, %59, %cst_32 {dimension_numbers = #tpu.dot_dimension_numbers<[1], [0], [0], [1], [0, 0, 1, 1], [], []>} : vector<8x64xf32>, vector<64x128xf32>, vector<8x128xf32> -> vector<8x128xf32>
    %c0_33 = arith.constant 0 : index
    %c0_34 = arith.constant 0 : index
    %61 = vector.load %arg10[%c0_33, %c0_34] : memref<1x128xf32, #tpu.memory_space<vmem>>, vector<1x128xf32>
    %62 = vector.broadcast %61 : vector<1x128xf32> to vector<8x128xf32>
    %63 = arith.addf %60, %62 : vector<8x128xf32>
    %cst_35 = arith.constant dense<0.000000e+00> : vector<128xf32>
    %64 = vector.multi_reduction <add>, %63, %cst_35 [0] : vector<8x128xf32> to vector<128xf32>
    %65 = vector.shape_cast %64 : vector<128xf32> to vector<1x128xf32>
    %cst_36 = arith.constant 8.000000e+00 : f32
    %66 = vector.broadcast %cst_36 : f32 to vector<1x128xf32>
    %67 = arith.divf %65, %66 : vector<1x128xf32>
    %68 = vector.broadcast %67 : vector<1x128xf32> to vector<8x128xf32>
    %69 = arith.subf %63, %68 : vector<8x128xf32>
    %70 = arith.mulf %69, %69 : vector<8x128xf32>
    %cst_37 = arith.constant dense<0.000000e+00> : vector<128xf32>
    %71 = vector.multi_reduction <add>, %70, %cst_37 [0] : vector<8x128xf32> to vector<128xf32>
    %72 = vector.shape_cast %71 : vector<128xf32> to vector<1x128xf32>
    %cst_38 = arith.constant 8.000000e+00 : f32
    %73 = vector.broadcast %cst_38 : f32 to vector<1x128xf32>
    %74 = arith.divf %72, %73 : vector<1x128xf32>
    %cst_39 = arith.constant 9.99999974E-6 : f32
    %75 = vector.broadcast %cst_39 : f32 to vector<1x128xf32>
    %76 = arith.addf %74, %75 : vector<1x128xf32>
    %77 = math.rsqrt %76 : vector<1x128xf32>
    %78 = vector.broadcast %77 : vector<1x128xf32> to vector<8x128xf32>
    %79 = arith.mulf %69, %78 : vector<8x128xf32>
    %c0_40 = arith.constant 0 : index
    %c0_41 = arith.constant 0 : index
    %80 = vector.load %arg11[%c0_40, %c0_41] : memref<1x128xf32, #tpu.memory_space<vmem>>, vector<1x128xf32>
    %81 = vector.broadcast %80 : vector<1x128xf32> to vector<8x128xf32>
    %82 = arith.mulf %79, %81 : vector<8x128xf32>
    %c0_42 = arith.constant 0 : index
    %c0_43 = arith.constant 0 : index
    %83 = vector.load %arg12[%c0_42, %c0_43] : memref<1x128xf32, #tpu.memory_space<vmem>>, vector<1x128xf32>
    %84 = vector.broadcast %83 : vector<1x128xf32> to vector<8x128xf32>
    %85 = arith.addf %82, %84 : vector<8x128xf32>
    %cst_44 = arith.constant 0.000000e+00 : f32
    %86 = vector.broadcast %cst_44 : f32 to vector<8x128xf32>
    %87 = arith.maximumf %85, %86 : vector<8x128xf32>
    %c0_45 = arith.constant 0 : index
    %c0_46 = arith.constant 0 : index
    %88 = vector.load %arg13[%c0_45, %c0_46] : memref<128x256xf32, #tpu.memory_space<vmem>>, vector<128x256xf32>
    %cst_47 = arith.constant dense<0.000000e+00> : vector<8x256xf32>
    %89 = tpu.matmul %87, %88, %cst_47 {dimension_numbers = #tpu.dot_dimension_numbers<[1], [0], [0], [1], [0, 0, 1, 1], [], []>} : vector<8x128xf32>, vector<128x256xf32>, vector<8x256xf32> -> vector<8x256xf32>
    %c0_48 = arith.constant 0 : index
    %c0_49 = arith.constant 0 : index
    %90 = vector.load %arg14[%c0_48, %c0_49] : memref<1x256xf32, #tpu.memory_space<vmem>>, vector<1x256xf32>
    %91 = vector.broadcast %90 : vector<1x256xf32> to vector<8x256xf32>
    %92 = arith.addf %89, %91 : vector<8x256xf32>
    %cst_50 = arith.constant dense<0.000000e+00> : vector<256xf32>
    %93 = vector.multi_reduction <add>, %92, %cst_50 [0] : vector<8x256xf32> to vector<256xf32>
    %94 = vector.shape_cast %93 : vector<256xf32> to vector<1x256xf32>
    %cst_51 = arith.constant 8.000000e+00 : f32
    %95 = vector.broadcast %cst_51 : f32 to vector<1x256xf32>
    %96 = arith.divf %94, %95 : vector<1x256xf32>
    %97 = vector.broadcast %96 : vector<1x256xf32> to vector<8x256xf32>
    %98 = arith.subf %92, %97 : vector<8x256xf32>
    %99 = arith.mulf %98, %98 : vector<8x256xf32>
    %cst_52 = arith.constant dense<0.000000e+00> : vector<256xf32>
    %100 = vector.multi_reduction <add>, %99, %cst_52 [0] : vector<8x256xf32> to vector<256xf32>
    %101 = vector.shape_cast %100 : vector<256xf32> to vector<1x256xf32>
    %cst_53 = arith.constant 8.000000e+00 : f32
    %102 = vector.broadcast %cst_53 : f32 to vector<1x256xf32>
    %103 = arith.divf %101, %102 : vector<1x256xf32>
    %cst_54 = arith.constant 9.99999974E-6 : f32
    %104 = vector.broadcast %cst_54 : f32 to vector<1x256xf32>
    %105 = arith.addf %103, %104 : vector<1x256xf32>
    %106 = math.rsqrt %105 : vector<1x256xf32>
    %107 = vector.broadcast %106 : vector<1x256xf32> to vector<8x256xf32>
    %108 = arith.mulf %98, %107 : vector<8x256xf32>
    %c0_55 = arith.constant 0 : index
    %c0_56 = arith.constant 0 : index
    %109 = vector.load %arg15[%c0_55, %c0_56] : memref<1x256xf32, #tpu.memory_space<vmem>>, vector<1x256xf32>
    %110 = vector.broadcast %109 : vector<1x256xf32> to vector<8x256xf32>
    %111 = arith.mulf %108, %110 : vector<8x256xf32>
    %c0_57 = arith.constant 0 : index
    %c0_58 = arith.constant 0 : index
    %112 = vector.load %arg16[%c0_57, %c0_58] : memref<1x256xf32, #tpu.memory_space<vmem>>, vector<1x256xf32>
    %113 = vector.broadcast %112 : vector<1x256xf32> to vector<8x256xf32>
    %114 = arith.addf %111, %113 : vector<8x256xf32>
    %cst_59 = arith.constant 0.000000e+00 : f32
    %115 = vector.broadcast %cst_59 : f32 to vector<8x256xf32>
    %116 = arith.maximumf %114, %115 : vector<8x256xf32>
    %c0_60 = arith.constant 0 : index
    %c0_61 = arith.constant 0 : index
    %117 = vector.load %arg17[%c0_60, %c0_61] : memref<256x64xf32, #tpu.memory_space<vmem>>, vector<256x64xf32>
    %cst_62 = arith.constant dense<0.000000e+00> : vector<8x64xf32>
    %118 = tpu.matmul %116, %117, %cst_62 {dimension_numbers = #tpu.dot_dimension_numbers<[1], [0], [0], [1], [0, 0, 1, 1], [], []>} : vector<8x256xf32>, vector<256x64xf32>, vector<8x64xf32> -> vector<8x64xf32>
    %c0_63 = arith.constant 0 : index
    %c0_64 = arith.constant 0 : index
    %119 = vector.load %arg18[%c0_63, %c0_64] : memref<1x64xf32, #tpu.memory_space<vmem>>, vector<1x64xf32>
    %120 = vector.broadcast %119 : vector<1x64xf32> to vector<8x64xf32>
    %121 = arith.addf %118, %120 : vector<8x64xf32>
    %122 = arith.negf %121 : vector<8x64xf32>
    %123 = math.exp %122 : vector<8x64xf32>
    %cst_65 = arith.constant 1.000000e+00 : f32
    %124 = vector.broadcast %cst_65 : f32 to vector<8x64xf32>
    %125 = arith.addf %124, %123 : vector<8x64xf32>
    %126 = arith.divf %124, %125 : vector<8x64xf32>
    %c0_66 = arith.constant 0 : index
    %c0_67 = arith.constant 0 : index
    %127 = vector.load %arg19[%c0_66, %c0_67] : memref<8x64xf32, #tpu.memory_space<vmem>>, vector<8x64xf32>
    tpu.vector_store %arg19[%c0_66, %c0_67], %126 {strides = array<i32>} : memref<8x64xf32, #tpu.memory_space<vmem>>, vector<8x64xf32>,
    return
  }
}

</mosaic_0001>

<bundles_post_ra>
// kernel: tpu_custom_call.1
= control target key start
LH: loop header
LB: loop body
LE: loop exit
PB: predicated region body
PF: predicated region fallthrough
CT: control target
= control target key end

     0   :  { %s1383_s0 = inlined_call_operand.vmem [shape: f32[8,16], index: 0, kind: input, shape index: {}]   ;;  %s1384_s1 = inlined_call_operand.vmem [shape: f32[16,32], index: 1, kind: input, shape index: {}]   ;;  %s1385_s2 = inlined_call_operand.vmem [shape: f32[1,32], index: 2, kind: input, shape index: {}]   ;;  %s1386_s3 = inlined_call_operand.vmem [shape: f32[1,32], index: 3, kind: input, shape index: {}]   ;;  %s1387_s4 = inlined_call_operand.vmem [shape: f32[1,32], index: 4, kind: input, shape index: {}]   ;;  %s1388_s5 = inlined_call_operand.vmem [shape: f32[32,64], index: 5, kind: input, shape index: {}]   ;;  %s1389_s6 = inlined_call_operand.vmem [shape: f32[1,64], index: 6, kind: input, shape index: {}]   ;;  %s1390_s7 = inlined_call_operand.vmem [shape: f32[1,64], index: 7, kind: input, shape index: {}]   ;;  %s1391_s8 = inlined_call_operand.vmem [shape: f32[1,64], index: 8, kind: input, shape index: {}]   ;;  %s1392_s9 = inlined_call_operand.vmem [shape: f32[64,128], index: 9, kind: input, shape index: {}]   ;;  %s1393_s10 = inlined_call_operand.vmem [shape: f32[1,128], index: 10, kind: input, shape index: {}]   ;;  %s1394_s11 = inlined_call_operand.vmem [shape: f32[1,128], index: 11, kind: input, shape index: {}]   ;;  %s1395_s12 = inlined_call_operand.vmem [shape: f32[1,128], index: 12, kind: input, shape index: {}]   ;;  %s1396_s13 = inlined_call_operand.vmem [shape: f32[128,256], index: 13, kind: input, shape index: {}]   ;;  %s1397_s14 = inlined_call_operand.vmem [shape: f32[1,256], index: 14, kind: input, shape index: {}]   ;;  %s1398_s15 = inlined_call_operand.vmem [shape: f32[1,256], index: 15, kind: input, shape index: {}]   ;;  %s1399_s16 = inlined_call_operand.vmem [shape: f32[1,256], index: 16, kind: input, shape index: {}]   ;;  %s1400_s17 = inlined_call_operand.vmem [shape: f32[256,64], index: 17, kind: input, shape index: {}]   ;;  %s1401_s18 = inlined_call_operand.vmem [shape: f32[1,64], index: 18, kind: input, shape index: {}]   ;;  %s1402_s19 = inlined_call_operand.hbm [shape: f32[8,64], index: 19, kind: output, shape index: {}]  }
   0x1   :  { %1404 = sst [smem:[#allocation5_spill]] %s1383_s0 }
   0x2   :  { %1405 = sst [smem:[#allocation6_spill]] %s1384_s1 }
   0x3   :  { %1406 = sst [smem:[#allocation7_spill]] %s1385_s2 }
   0x4   :  { %1407 = sst [smem:[#allocation8_spill]] %s1386_s3 }
   0x5   :  { %s1408_s20 = sld [smem:[#allocation6_spill]]  ;;  %v977_v2 = vmov 0.0|0.0   ;;  %vm978_vm0 = vmmov 0   ;;  %v979_v4 = vmov 0.0  }
   0x6   :  { %850 = vmatprep.subr.bf16.mxu1 %v977_v2  ;;  %817 = vmatprep.mubr.msk.f32.mxu1 %vm978_vm0, %v979_v4 }
   0xb   :  { %v64_v0 = vld [vmem:[%s1408_s20] sm:$0xff]  ;;  %v65_v1 = vld [vmem:[%s1408_s20 + $0x8] sm:$0xff] }
   0xc   :  { %v851_v3 = vpack.c.bf16 %v65_v1, %v64_v0 }
   0xd   :  { %24 = vsyncpa [#allocation3], 0  ;;  %859 = vmatprep.subr.bf16.mxu0 %v977_v2  ;;  %847 = vmatprep.mubr.msk.f32.mxu0 %vm978_vm0, %v979_v4  ;;  %s1409_s23 = sld [smem:[#allocation5_spill]]  ;;  %vm73_vm1 = vcmask 130048   ;;  %v187_v6 = vld [vmem:[%s1388_s5] sm:$0xff]  ;;  %v188_v7 = vld [vmem:[%s1388_s5 + $0x8] sm:$0xff] }
   0xe   :  { %852 = vmatpush3.bf16.msra.mxu1 %v851_v3  ;;  %v854_v8 = vpack.c.bf16 %v188_v7, %v187_v6  ;;  %v189_v9 = vld [vmem:[%s1388_s5 + $0x10] sm:$0xff]  ;;  %v190_v10 = vld [vmem:[%s1388_s5 + $0x18] sm:$0xff]  ;;  %s1410_s21 = sld [smem:[#allocation7_spill]]  ;;  %vm147_vm2 = vcmask 261120   ;;  %s1411_s22 = sld [smem:[#allocation8_spill]]  ;;  %v310_v42 = vld [vmem:[%s1392_s9] sm:$0xff] }
   0xf   :  { %853 = vmatprep.subr.bf16.mxu1 %v977_v2  ;;  %v857_v11 = vpack.c.bf16 %v190_v10, %v189_v9  ;;  %v750_v38 = vld [vmem:[%s1387_s4] ss:$0 sm:$0xff]  ;;  %v311_v43 = vld [vmem:[%s1392_s9 + $0x8] sm:$0xff]  ;;  %v312_v45 = vld [vmem:[%s1392_s9 + $0x10] sm:$0xff]  ;;  %vm271_vm3 = vcmask 523264  }
  0x10   :  { %v860_v44 = vpack.c.bf16 %v311_v43, %v310_v42  ;;  %v313_v46 = vld [vmem:[%s1392_s9 + $0x18] sm:$0xff]  ;;  %v314_v48 = vld [vmem:[%s1392_s9 + $0x20] sm:$0xff]  ;;  %v315_v49 = vld [vmem:[%s1392_s9 + $0x28] sm:$0xff] }
  0x11   :  { %v863_v47 = vpack.c.bf16 %v313_v46, %v312_v45  ;;  %v866_v50 = vpack.c.bf16 %v315_v49, %v314_v48  ;;  %v316_v51 = vld [vmem:[%s1392_s9 + $0x30] sm:$0xff]  ;;  %v317_v52 = vld [vmem:[%s1392_s9 + $0x38] sm:$0xff]  ;;  %v751_v54 = vld [vmem:[%s1389_s6] ss:$0 sm:$0xff] }
  0x12   :  { %861 = vmatpush3.bf16.msra.mxu0 %v860_v44  ;;  %v869_v53 = vpack.c.bf16 %v317_v52, %v316_v51  ;;  %v448_v42 = vld [vmem:[%s1396_s13 + $0x70] sm:$0xff]  ;;  %v451_v44 = vld [vmem:[%s1396_s13 + $0x88] sm:$0xff]  ;;  %v453_v45 = vld [vmem:[%s1396_s13 + $0x98] sm:$0xff] }
  0x13   :  { %v63_v5 = vld [vmem:[%s1409_s23] sm:$0xff]  ;;  %862 = vmatprep.subr.bf16.mxu0 %v977_v2  ;;  %v887_v46 = vpack.c.bf16 %v453_v45, %v451_v44  ;;  %v452_v48 = vld [vmem:[%s1396_s13 + $0x90] sm:$0xff]  ;;  %v457_v51 = vld [vmem:[%s1396_s13 + $0xb8] sm:$0xff] }
  0x14   :  { %818 = vmatmul.mubr.msk.f32.vlgmr.msra.gmra.mrb[0].mxu1 %vm73_vm1, %v63_v5  ;;  %v747_v12 = vld [vmem:[%s1410_s21] ss:$0 sm:$0xff]  ;;  %v638_v45 = vld [vmem:[%s1400_s17 + $0xa8] sm:$0xff] }
  0x15   :  { %828 = vmatprep.mubr.msk.f32.mxu1 %vm978_vm0, %v979_v4  ;;  %855 = vmatpush3.bf16.msra.mxu1 %v854_v8  ;;  %v749_v36 = vld [vmem:[%s1411_s22] ss:$0 sm:$0xff] }
  0x16   :  { %856 = vmatprep.subr.bf16.mxu1 %v977_v2  ;;  %864 = vmatpush3.bf16.msra.mxu0 %v863_v47  ;;  %v450_v47 = vld [vmem:[%s1396_s13 + $0x80] sm:$0xff] }
  0x17   :  { %865 = vmatprep.subr.bf16.mxu0 %v977_v2  ;;  %v889_v49 = vpack.c.bf16 %v452_v48, %v450_v47  ;;  %v637_v44 = vld [vmem:[%s1400_s17 + $0xa0] sm:$0xff]  ;;  %v622_v48 = vld [vmem:[%s1400_s17 + $0x28] sm:$0xff] }
  0x18   :  { %v621_v47 = vld [vmem:[%s1400_s17 + $0x20] sm:$0xff] }
  0x19   :  { %858 = vmatpush3.bf16.msra.mxu1 %v857_v11 }
  0x1a   :  { %867 = vmatpush3.bf16.msra.mxu0 %v866_v50  ;;  %v455_v50 = vld [vmem:[%s1396_s13 + $0xa8] sm:$0xff] }
  0x1b   :  { %868 = vmatprep.subr.bf16.mxu0 %v977_v2  ;;  %v891_v52 = vpack.c.bf16 %v457_v51, %v455_v50  ;;  %v639_v50 = vld [vmem:[%s1400_s17 + $0xb0] sm:$0xff]  ;;  %v640_v51 = vld [vmem:[%s1400_s17 + $0xb8] sm:$0xff] }
  0x1e   :  { %870 = vmatpush3.bf16.msra.mxu0 %v869_v53  ;;  %v454_v53 = vld [vmem:[%s1396_s13 + $0xa0] sm:$0xff] }
  0xe7   :  { %v143_v13 = vpop.f32.mrb[0].mxu1 }
  0xe8   :  { %v144_v14 = vadd.f32 %v747_v12, %v143_v13  ;;  %v819_v15 = vpop.f32.mrb[1].mxu1 }
  0xea   :  { %v148_v16 = vsel %vm147_vm2, %v144_v14, 0.0 }
  0xeb   :  { %v149_v17 = vrot.slane %v148_v16, 4 }
  0xed   :  { %v150_v18 = vadd.f32 %v149_v17, %v148_v16  ;;  %v754_v16 = vld [vmem:[%s1391_s8] ss:$0 sm:$0xff] }
  0xef   :  { %v151_v19 = vrot.slane %v150_v18, 2 }
  0xf1   :  { %v152_v20 = vadd.f32 %v151_v19, %v150_v18 }
  0xf3   :  { %v153_v21 = vrot.slane %v152_v20, 1 }
  0xf5   :  { %v154_v22 = vadd.f32 %v153_v21, %v152_v20  ;;  %v435_v20 = vld [vmem:[%s1396_s13 + $0x8] sm:$0xff]  ;;  %v437_v21 = vld [vmem:[%s1396_s13 + $0x18] sm:$0xff] }
  0xf7   :  { %v156_v23 = vmul.f32 0.125, %v154_v22  ;;  %v871_v22 = vpack.c.bf16 %v437_v21, %v435_v20 }
  0xf9   :  { %v157_v24 = vsub.f32 %v144_v14, %v156_v23  ;;  %v753_v14 = vld [vmem:[%s1390_s7] ss:$0 sm:$0xff]  ;;  %872 = vmatprep.subr.bf16.mxu1 %v871_v22 }
  0xfa   :  { %v434_v23 = vld [vmem:[%s1396_s13] sm:$0xff] }
  0xfb   :  { %v158_v25 = vmul.f32 %v157_v24, %v157_v24 }
  0xfd   :  { %v159_v26 = vsel %vm147_vm2, %v158_v25, 0.0 }
  0xfe   :  { %v160_v27 = vrot.slane %v159_v26, 4 }
 0x100   :  { %v161_v28 = vadd.f32 %v160_v27, %v159_v26  ;;  %v439_v26 = vld [vmem:[%s1396_s13 + $0x28] sm:$0xff]  ;;  %v441_v27 = vld [vmem:[%s1396_s13 + $0x38] sm:$0xff] }
 0x102   :  { %v162_v29 = vrot.slane %v161_v28, 2 }
 0x104   :  { %v163_v30 = vadd.f32 %v162_v29, %v161_v28  ;;  %v875_v28 = vpack.c.bf16 %v441_v27, %v439_v26  ;;  %v438_v29 = vld [vmem:[%s1396_s13 + $0x20] sm:$0xff] }
 0x105   :  { %v757_v26 = vld [vmem:[%s1394_s11] ss:$0 sm:$0xff] }
 0x106   :  { %v164_v31 = vrot.slane %v163_v30, 1 }
 0x108   :  { %v165_v32 = vadd.f32 %v164_v31, %v163_v30  ;;  %v440_v30 = vld [vmem:[%s1396_s13 + $0x30] sm:$0xff] }
 0x109   :  { %v877_v31 = vpack.c.bf16 %v440_v30, %v438_v29 }
 0x10a   :  { %v166_v33 = vmul.f32 0.125, %v165_v32  ;;  %v443_v32 = vld [vmem:[%s1396_s13 + $0x48] sm:$0xff] }
 0x10c   :  { %v167_v34 = vadd.f32 1e-05, %v166_v33  ;;  %v445_v33 = vld [vmem:[%s1396_s13 + $0x58] sm:$0xff] }
 0x10e   :  { %939 = vrsqrt.f32 %v167_v34  ;;  %v879_v34 = vpack.c.bf16 %v445_v33, %v443_v32  ;;  %v633_v32 = vld [vmem:[%s1400_s17 + $0x80] sm:$0xff]  ;;  %v634_v33 = vld [vmem:[%s1400_s17 + $0x88] sm:$0xff] }
 0x118   :  { %v940_v35 = vpop.eup %939 }
 0x119   :  { %v169_v37 = vmul.f32 %v940_v35, %v157_v24  ;;  %v436_v24 = vld [vmem:[%s1396_s13 + $0x10] sm:$0xff]  ;;  %v442_v35 = vld [vmem:[%s1396_s13 + $0x40] sm:$0xff] }
 0x11a   :  { %v873_v25 = vpack.c.bf16 %v436_v24, %v434_v23 }
 0x11b   :  { %v177_v39 = vmul.f32 %v749_v36, %v169_v37  ;;  %v444_v36 = vld [vmem:[%s1396_s13 + $0x50] sm:$0xff] }
 0x11c   :  { %v881_v37 = vpack.c.bf16 %v444_v36, %v442_v35  ;;  %v617_v35 = vld [vmem:[%s1400_s17] sm:$0xff]  ;;  %v618_v36 = vld [vmem:[%s1400_s17 + $0x8] sm:$0xff] }
 0x11d   :  { %v185_v40 = vadd.f32 %v750_v38, %v177_v39  ;;  %v447_v38 = vld [vmem:[%s1396_s13 + $0x68] sm:$0xff]  ;;  %v449_v39 = vld [vmem:[%s1396_s13 + $0x78] sm:$0xff] }
 0x11f   :  { %v186_v41 = vmax.f32 %v185_v40, 0.0  ;;  %v883_v40 = vpack.c.bf16 %v449_v39, %v447_v38  ;;  %v635_v38 = vld [vmem:[%s1400_s17 + $0x90] sm:$0xff]  ;;  %v636_v39 = vld [vmem:[%s1400_s17 + $0x98] sm:$0xff] }
 0x121   :  { %829 = vmatmul.mubr.msk.f32.vlgmr.msra.gmra.mrb[2].mxu1 %vm147_vm2, %v186_v41  ;;  %v446_v41 = vld [vmem:[%s1396_s13 + $0x60] sm:$0xff] }
 0x122   :  { %542 = vmatprep.mubr.f32.mxu1 %v979_v4  ;;  %874 = vmatpush1.bf16.msra.mxu1 %v873_v25  ;;  %v885_v43 = vpack.c.bf16 %v448_v42, %v446_v41  ;;  %v619_v41 = vld [vmem:[%s1400_s17 + $0x10] sm:$0xff]  ;;  %v620_v42 = vld [vmem:[%s1400_s17 + $0x18] sm:$0xff] }
 0x123   :  { %876 = vmatprep.subr.bf16.mxu1 %v875_v28  ;;  %v758_v28 = vld [vmem:[%s1395_s12] ss:$0 sm:$0xff] }
 0x126   :  { %878 = vmatpush1.bf16.msra.mxu1 %v877_v31 }
 0x127   :  { %880 = vmatprep.subr.bf16.mxu1 %v879_v34  ;;  %v903_v34 = vpack.c.bf16 %v634_v33, %v633_v32 }
 0x129   :  { %904 = vmatprep.subr.bf16.mxu0 %v903_v34 }
 0x12a   :  { %882 = vmatpush1.bf16.msra.mxu1 %v881_v37  ;;  %v905_v37 = vpack.c.bf16 %v618_v36, %v617_v35 }
 0x12b   :  { %884 = vmatprep.subr.bf16.mxu1 %v883_v40  ;;  %v907_v40 = vpack.c.bf16 %v636_v39, %v635_v38 }
 0x12e   :  { %886 = vmatpush1.bf16.msra.mxu1 %v885_v43  ;;  %v909_v43 = vpack.c.bf16 %v620_v42, %v619_v41 }
 0x12f   :  { %888 = vmatprep.subr.bf16.mxu1 %v887_v46  ;;  %v911_v46 = vpack.c.bf16 %v638_v45, %v637_v44 }
 0x132   :  { %890 = vmatpush1.bf16.msra.mxu1 %v889_v49  ;;  %v913_v49 = vpack.c.bf16 %v622_v48, %v621_v47 }
 0x133   :  { %892 = vmatprep.subr.bf16.mxu1 %v891_v52  ;;  %v915_v52 = vpack.c.bf16 %v640_v51, %v639_v50 }
 0x1f4   :  { %v267_v55 = vpop.f32.mrb[2].mxu1 }
 0x1f5   :  { %v268_v56 = vadd.f32 %v751_v54, %v267_v55  ;;  %v830_v57 = vpop.f32.mrb[3].mxu1  ;;  %v456_v54 = vld [vmem:[%s1396_s13 + $0xb0] sm:$0xff] }
 0x1f6   :  { %v893_v55 = vpack.c.bf16 %v456_v54, %v454_v53  ;;  %v461_v57 = vld [vmem:[%s1396_s13 + $0xd8] sm:$0xff]  ;;  %v623_v53 = vld [vmem:[%s1400_s17 + $0x30] sm:$0xff] }
 0x1f7   :  { %v272_v58 = vsel %vm271_vm3, %v268_v56, 0.0  ;;  %v624_v54 = vld [vmem:[%s1400_s17 + $0x38] sm:$0xff] }
 0x1f8   :  { %v273_v59 = vrot.slane %v272_v58, 4  ;;  %894 = vmatpush1.bf16.msra.mxu1 %v893_v55  ;;  %v917_v55 = vpack.c.bf16 %v624_v54, %v623_v53 }
 0x1fa   :  { %v274_v60 = vadd.f32 %v273_v59, %v272_v58  ;;  %v458_v59 = vld [vmem:[%s1396_s13 + $0xc0] sm:$0xff] }
 0x1fc   :  { %v275_v61 = vrot.slane %v274_v60, 2 }
 0x1fe   :  { %v276_v62 = vadd.f32 %v275_v61, %v274_v60  ;;  %v460_v60 = vld [vmem:[%s1396_s13 + $0xd0] sm:$0xff] }
 0x1ff   :  { %v897_v61 = vpack.c.bf16 %v460_v60, %v458_v59  ;;  %v625_v59 = vld [vmem:[%s1400_s17 + $0x40] sm:$0xff]  ;;  %v626_v60 = vld [vmem:[%s1400_s17 + $0x48] sm:$0xff] }
 0x200   :  { %v277_v63 = vrot.slane %v276_v62, 1 }
 0x202   :  { %v278_v0 = vadd.f32 %v277_v63, %v276_v62  ;;  %v463_v62 = vld [vmem:[%s1396_s13 + $0xe8] sm:$0xff]  ;;  %v465_v63 = vld [vmem:[%s1396_s13 + $0xf8] sm:$0xff] }
 0x204   :  { %v279_v1 = vmul.f32 0.125, %v278_v0  ;;  %v899_v0 = vpack.c.bf16 %v465_v63, %v463_v62  ;;  %v643_v62 = vld [vmem:[%s1400_s17 + $0xd0] sm:$0xff]  ;;  %v644_v63 = vld [vmem:[%s1400_s17 + $0xd8] sm:$0xff] }
 0x206   :  { %v280_v2 = vsub.f32 %v268_v56, %v279_v1  ;;  %v459_v56 = vld [vmem:[%s1396_s13 + $0xc8] sm:$0xff]  ;;  %v462_v1 = vld [vmem:[%s1396_s13 + $0xe0] sm:$0xff] }
 0x207   :  { %v895_v58 = vpack.c.bf16 %v461_v57, %v459_v56  ;;  %v641_v56 = vld [vmem:[%s1400_s17 + $0xc0] sm:$0xff]  ;;  %v642_v57 = vld [vmem:[%s1400_s17 + $0xc8] sm:$0xff] }
 0x208   :  { %v281_v3 = vmul.f32 %v280_v2, %v280_v2 }
 0x209   :  { %896 = vmatprep.subr.bf16.mxu1 %v895_v58  ;;  %v919_v58 = vpack.c.bf16 %v642_v57, %v641_v56 }
 0x20a   :  { %v282_v4 = vsel %vm271_vm3, %v281_v3, 0.0  ;;  %898 = vmatpush1.bf16.msra.mxu1 %v897_v61  ;;  %v921_v61 = vpack.c.bf16 %v626_v60, %v625_v59 }
 0x20b   :  { %v283_v5 = vrot.slane %v282_v4, 4  ;;  %900 = vmatprep.subr.bf16.mxu1 %v899_v0  ;;  %v923_v0 = vpack.c.bf16 %v644_v63, %v643_v62  ;;  %v601_v62 = vld [vmem:[%s1399_s16] sm:$0x3]  ;;  %s980_s16 = smov [#allocation2]  }
 0x20c   :  { %s739_s27 = sshll.u32 %s980_s16, 4  ;;  %s740_s27 = int_to_ptr.vmem [resolvable:$true] %s739_s27 }
 0x20d   :  { %v284_v6 = vadd.f32 %v283_v5, %v282_v4  ;;  %v755_v4 = vld [vmem:[%s1393_s10] ss:$0 sm:$0xff]  ;;  %s953_s4 = scalar_lea.vmem %s740_s27, 128  ;;  %p958_p1 = scmp.lt.s32.totalorder %s740_s27, %s740_s27 }
 0x20e   :  { %p954_p0 = scmp.ne.s32.totalorder %s740_s27, %s953_s4  ;;  %p959_p2 = scmp.lt.s32.totalorder %s953_s4, %s953_s4 }
 0x20f   :  { %v285_v7 = vrot.slane %v284_v6, 2 }
 0x210   :  { %p960_p3 = por %p959_p2, %p958_p1 }
 0x211   :  { %v286_v8 = vadd.f32 %v285_v7, %v284_v6 }
 0x212   :  { %p961_p4 = pnand %p960_p3, %p954_p0 }
 0x213   :  { %v287_v9 = vrot.slane %v286_v8, 1 }
 0x215   :  { %v288_v10 = vadd.f32 %v287_v9, %v286_v8 }
 0x217   :  { %v289_v11 = vmul.f32 0.125, %v288_v10 }
 0x219   :  { %v290_v12 = vadd.f32 1e-05, %v289_v11 }
 0x21b   :  { %941 = vrsqrt.f32 %v290_v12 }
 0x225   :  { %v942_v13 = vpop.eup %941 }
 0x226   :  { %v292_v15 = vmul.f32 %v942_v13, %v280_v2  ;;  %v464_v2 = vld [vmem:[%s1396_s13 + $0xf0] sm:$0xff] }
 0x227   :  { %v901_v3 = vpack.c.bf16 %v464_v2, %v462_v1  ;;  %v627_v1 = vld [vmem:[%s1400_s17 + $0x50] sm:$0xff]  ;;  %v628_v2 = vld [vmem:[%s1400_s17 + $0x58] sm:$0xff] }
 0x228   :  { %v300_v17 = vmul.f32 %v753_v14, %v292_v15 }
 0x229   :  { %902 = vmatpush1.bf16.msra.mxu1 %v901_v3  ;;  %v925_v3 = vpack.c.bf16 %v628_v2, %v627_v1 }
 0x22a   :  { %v308_v18 = vadd.f32 %v754_v16, %v300_v17 }
 0x22c   :  { %v309_v19 = vmax.f32 %v308_v18, 0.0 }
 0x22e   :  { %848 = vmatmul.mubr.msk.f32.vlgmr.msra.gmra.mrb[0].mxu0 %vm271_vm3, %v309_v19 }
 0x22f   :  { %906 = vmatpush3.bf16.msra.mxu0 %v905_v37 }
 0x230   :  { %908 = vmatprep.subr.bf16.mxu0 %v907_v40 }
 0x233   :  { %910 = vmatpush3.bf16.msra.mxu0 %v909_v43 }
 0x234   :  { %912 = vmatprep.subr.bf16.mxu0 %v911_v46 }
 0x237   :  { %914 = vmatpush3.bf16.msra.mxu0 %v913_v49 }
 0x238   :  { %916 = vmatprep.subr.bf16.mxu0 %v915_v52 }
 0x23b   :  { %918 = vmatpush3.bf16.msra.mxu0 %v917_v55 }
 0x23c   :  { %920 = vmatprep.subr.bf16.mxu0 %v919_v58 }
 0x23f   :  { %922 = vmatpush3.bf16.msra.mxu0 %v921_v61  ;;  %v587_v61 = vld [vmem:[%s1398_s15] sm:$0x3] }
 0x240   :  { %924 = vmatprep.subr.bf16.mxu0 %v923_v0 }
 0x243   :  { %926 = vmatpush3.bf16.msra.mxu0 %v925_v3 }
 0x301   :  { %v394_v5 = vpop.f32.mrb[0].mxu0 }
 0x302   :  { %v395_v6 = vadd.f32 %v755_v4, %v394_v5  ;;  %v849_v7 = vpop.f32.mrb[1].mxu0  ;;  %v645_v4 = vld [vmem:[%s1400_s17 + $0xe0] sm:$0xff]  ;;  %v646_v5 = vld [vmem:[%s1400_s17 + $0xe8] sm:$0xff] }
 0x303   :  { %v629_v7 = vld [vmem:[%s1400_s17 + $0x60] sm:$0xff] }
 0x304   :  { %v398_v8 = vrot.slane %v395_v6, 4 }
 0x306   :  { %v399_v9 = vadd.f32 %v398_v8, %v395_v6  ;;  %v630_v8 = vld [vmem:[%s1400_s17 + $0x68] sm:$0xff] }
 0x308   :  { %v400_v10 = vrot.slane %v399_v9, 2 }
 0x30a   :  { %v401_v11 = vadd.f32 %v400_v10, %v399_v9  ;;  %v929_v9 = vpack.c.bf16 %v630_v8, %v629_v7  ;;  %v647_v10 = vld [vmem:[%s1400_s17 + $0xf0] sm:$0xff] }
 0x30c   :  { %v402_v12 = vrot.slane %v401_v11, 1 }
 0x30e   :  { %v403_v13 = vadd.f32 %v402_v12, %v401_v11  ;;  %v648_v11 = vld [vmem:[%s1400_s17 + $0xf8] sm:$0xff]  ;;  %v631_v12 = vld [vmem:[%s1400_s17 + $0x70] sm:$0xff] }
 0x310   :  { %v404_v14 = vmul.f32 0.125, %v403_v13  ;;  %v931_v13 = vpack.c.bf16 %v648_v11, %v647_v10 }
 0x312   :  { %v405_v15 = vsub.f32 %v395_v6, %v404_v14  ;;  %v927_v6 = vpack.c.bf16 %v646_v5, %v645_v4  ;;  %v632_v14 = vld [vmem:[%s1400_s17 + $0x78] sm:$0xff] }
 0x314   :  { %v406_v16 = vmul.f32 %v405_v15, %v405_v15  ;;  %928 = vmatprep.subr.bf16.mxu0 %v927_v6 }
 0x315   :  { %930 = vmatpush3.bf16.msra.mxu0 %v929_v9 }
 0x316   :  { %v407_v17 = vrot.slane %v406_v16, 4  ;;  %932 = vmatprep.subr.bf16.mxu0 %v931_v13 }
 0x318   :  { %v408_v18 = vadd.f32 %v407_v17, %v406_v16  ;;  %v468_v16 = vlaneseq }
 0x31a   :  { %v409_v19 = vrot.slane %v408_v18, 2  ;;  %v469_v17 = vshrl.u32 %v468_v16, 7 }
 0x31c   :  { %v410_v20 = vadd.f32 %v409_v19, %v408_v18  ;;  %v470_v18 = vsub.s32 0, %v469_v17  ;;  %v466_v19 = vld [vmem:[%s1397_s14] sm:$0x3] }
 0x31e   :  { %v411_v21 = vrot.slane %v410_v20, 1  ;;  %v592_v63 = vrot.slane %v587_v61, %v470_v18  ;;  %v606_v4 = vrot.slane %v601_v62, %v470_v18 }
 0x320   :  { %v412_v22 = vadd.f32 %v411_v21, %v410_v20  ;;  %v474_v20 = vsub.s32 1, %v469_v17  ;;  %v471_v21 = vrot.slane %v466_v19, %v470_v18 }
 0x322   :  { %v413_v23 = vmul.f32 0.125, %v412_v22  ;;  %v475_v22 = vrot.slane %v466_v19, %v474_v20  ;;  %v596_v1 = vrot.slane %v587_v61, %v474_v20  ;;  %v610_v6 = vrot.slane %v601_v62, %v474_v20 }
 0x324   :  { %v414_v24 = vadd.f32 1e-05, %v413_v23 }
 0x326   :  { %943 = vrsqrt.f32 %v414_v24 }
 0x330   :  { %v944_v25 = vpop.eup %943 }
 0x331   :  { %v416_v27 = vmul.f32 %v944_v25, %v405_v15  ;;  %v933_v15 = vpack.c.bf16 %v632_v14, %v631_v12  ;;  %v759_v14 = vld [vmem:[%s1401_s18] ss:$0 sm:$0xff] }
 0x333   :  { %v424_v29 = vmul.f32 %v757_v26, %v416_v27  ;;  %934 = vmatpush3.bf16.msra.mxu0 %v933_v15 }
 0x335   :  { %v432_v30 = vadd.f32 %v758_v28, %v424_v29 }
 0x337   :  { %v433_v31 = vmax.f32 %v432_v30, 0.0 }
 0x339   :  { %543 = vmatmul.mubr.f32.vlgmr.msra.gmra.mrb[4].mxu1 %v433_v31 }
 0x40c   :  { %v544_v23 = vpop.f32.mrb[4].mxu1 }
 0x40d   :  { %v545_v24 = vadd.f32 %v544_v23, %v471_v21  ;;  %v546_v25 = vpop.f32.mrb[5].mxu1 }
 0x40e   :  { %v547_v26 = vadd.f32 %v546_v25, %v475_v22 }
 0x40f   :  { %v549_v27 = vrot.slane %v545_v24, 4 }
 0x410   :  { %v555_v28 = vrot.slane %v547_v26, 4 }
 0x411   :  { %v550_v29 = vadd.f32 %v549_v27, %v545_v24 }
 0x412   :  { %v556_v30 = vadd.f32 %v555_v28, %v547_v26 }
 0x413   :  { %v551_v31 = vrot.slane %v550_v29, 2 }
 0x414   :  { %v557_v32 = vrot.slane %v556_v30, 2 }
 0x415   :  { %v552_v33 = vadd.f32 %v551_v31, %v550_v29 }
 0x416   :  { %v558_v34 = vadd.f32 %v557_v32, %v556_v30 }
 0x417   :  { %v553_v35 = vrot.slane %v552_v33, 1 }
 0x418   :  { %v559_v36 = vrot.slane %v558_v34, 1 }
 0x419   :  { %v554_v37 = vadd.f32 %v553_v35, %v552_v33 }
 0x41a   :  { %v560_v38 = vadd.f32 %v559_v36, %v558_v34 }
 0x41b   :  { %v561_v39 = vmul.f32 0.125, %v554_v37 }
 0x41c   :  { %v562_v40 = vmul.f32 0.125, %v560_v38 }
 0x41d   :  { %v563_v41 = vsub.f32 %v545_v24, %v561_v39 }
 0x41e   :  { %v564_v42 = vsub.f32 %v547_v26, %v562_v40 }
 0x41f   :  { %v565_v43 = vmul.f32 %v563_v41, %v563_v41 }
 0x420   :  { %v566_v44 = vmul.f32 %v564_v42, %v564_v42 }
 0x421   :  { %v567_v45 = vrot.slane %v565_v43, 4 }
 0x422   :  { %v573_v46 = vrot.slane %v566_v44, 4 }
 0x423   :  { %v568_v47 = vadd.f32 %v567_v45, %v565_v43 }
 0x424   :  { %v574_v48 = vadd.f32 %v573_v46, %v566_v44 }
 0x425   :  { %v569_v49 = vrot.slane %v568_v47, 2 }
 0x426   :  { %v575_v50 = vrot.slane %v574_v48, 2 }
 0x427   :  { %v570_v51 = vadd.f32 %v569_v49, %v568_v47 }
 0x428   :  { %v576_v52 = vadd.f32 %v575_v50, %v574_v48 }
 0x429   :  { %v571_v53 = vrot.slane %v570_v51, 1 }
 0x42a   :  { %v577_v54 = vrot.slane %v576_v52, 1 }
 0x42b   :  { %v572_v55 = vadd.f32 %v571_v53, %v570_v51 }
 0x42c   :  { %v578_v56 = vadd.f32 %v577_v54, %v576_v52 }
 0x42d   :  { %v579_v57 = vmul.f32 0.125, %v572_v55 }
 0x42e   :  { %v580_v58 = vmul.f32 0.125, %v578_v56 }
 0x42f   :  { %v581_v59 = vadd.f32 1e-05, %v579_v57 }
 0x430   :  { %v582_v60 = vadd.f32 1e-05, %v580_v58 }
 0x431   :  { %945 = vrsqrt.f32 %v581_v59 }
 0x432   :  { %947 = vrsqrt.f32 %v582_v60 }
 0x43b   :  { %v946_v0 = vpop.eup %945 }
 0x43c   :  { %v948_v2 = vpop.eup %947  ;;  %v585_v3 = vmul.f32 %v946_v0, %v563_v41 }
 0x43d   :  { %v586_v5 = vmul.f32 %v948_v2, %v564_v42 }
 0x43e   :  { %v599_v7 = vmul.f32 %v592_v63, %v585_v3 }
 0x43f   :  { %v600_v8 = vmul.f32 %v596_v1, %v586_v5 }
 0x440   :  { %v613_v9 = vadd.f32 %v606_v4, %v599_v7 }
 0x441   :  { %v614_v10 = vadd.f32 %v610_v6, %v600_v8 }
 0x442   :  { %v615_v12 = vmax.f32 %v613_v9, 0.0 }
 0x443   :  { %v616_v11 = vmax.f32 %v614_v10, 0.0 }
 0x445   :  { %720 = vmatprep.mubr.f32.mxu0 %v616_v11 }
 0x446   :  { %721 = vmatmul.mubr.f32.vlgmr.msra.gmra.mrb[2].mxu0 %v615_v12 }
 0x519   :  { %v810_v13 = vpop.f32.mrb[2].mxu0 }
 0x51a   :  { %v811_v15 = vpop.f32.mrb[3].mxu0 }
 0x51b   :  { %v812_v16 = vadd.f32 %v811_v15, %v810_v13 }
 0x51d   :  { %v723_v17 = vadd.f32 %v812_v16, %v759_v14 }
 0x51f   :  { %v760_v19 = vmul.f32 -1.442695, %v723_v17 }
 0x521   :  { %949 = vpow2.f32 %v760_v19 }
 0x52b   :  { %v950_v18 = vpop.eup %949 }
 0x52c   :  { %v729_v20 = vadd.f32 1.0, %v950_v18 }
 0x52e   :  { %951 = vrcp.f32 %v729_v20 }
 0x538   :  { %v952_v21 = vpop.eup %951 }
 0x539   :  { %732 = vst.msk [vmem:[#allocation2] sm:$0xff] %vm271_vm3, %v952_v21 }
 0x53a   :  { %964 = shalt.err (!%p961_p4)
}
 0x53b   :  { %s965_s13 = scalar_lea.hbm %s1402_s19, 128 }
 0x53c   :  { %p966_p5 = scmp.ne.s32.totalorder %s1402_s19, %s965_s13  ;;  %p969_p6 = scmp.lt.u32.totalorder %s965_s13, %s1402_s19 }
 0x53e   :  { %p971_p7 = pnand %p969_p6, %p966_p5 }
 0x540   :  { %974 = shalt.err (!%p971_p7)
}
 0x541   :  { %742 = dma.vmem_to_hbm [thread:$0]  %s740_s27, 128, %s1402_s19, [#allocation3]  }
 0x542   :  { %975 = dma.done.wait [#allocation3], 128  }
 0x543   :  { %976 = vsyncadd [#allocation3], 4294967168 }
 0x544   :  { %746 = vsyncpa [#allocation3], 1 }

</bundles_post_ra>
